<compile_context>
chip_gen: v6e
topology: v6e:2x2x1
jax: 0.10.0
libtpu: 0.0.40
codegen_flags: <defaults>
</compile_context>

<pallas_src>
import jax
import jax.numpy as jnp
from jax import lax
from jax.experimental import pallas as pl
from jax.experimental.pallas import tpu as pltpu

INPUT_DIM = 32
H1, H2, H3, OUT = 96, 48, 24, 1


def _round_up(n, m):
    return ((n + m - 1) // m) * m


def _num_tensorcores():
    """Best-effort TensorCores-per-device count (v7x / megacore: 2, v5e/v6e: 1)."""
    try:
        info = pltpu.get_tpu_info()
        for name in ("num_tensorcores", "tensorcores_per_chip", "num_cores", "core_count"):
            v = getattr(info, name, None)
            if isinstance(v, int) and v > 0:
                return v
    except Exception:
        pass
    try:
        dev = jax.devices()[0]
        v = getattr(dev, "num_cores", None)
        if isinstance(v, int) and v > 0:
            return v
        kind = str(getattr(dev, "device_kind", "")).lower()
        if "7x" in kind or "v7" in kind or "v4" in kind:
            return 2
    except Exception:
        pass
    return 1


def _mlp_kernel(x_ref, w1_ref, b1_ref, w2_ref, b2_ref, w3_ref, b3_ref,
                wo_t_ref, bo_ref, out_ref):
    # Batch lives on the lane axis: every activation is (features, bm).
    # Layer 1: contract x's feature axis directly -- no materialized transpose of x.
    x = x_ref[...].astype(jnp.bfloat16)                                   # (bm, D) bf16
    h = lax.dot_general(w1_ref[...], x,
                        dimension_numbers=(((1,), (1,)), ((), ())),
                        preferred_element_type=jnp.float32)               # (96, bm) f32
    h = jnp.maximum(h + b1_ref[...], 0.0)
    # TODO(synk): training-mode Dropout(p=0.25) not implemented (eval-mode identity).

    h = jnp.dot(w2_ref[...], h.astype(jnp.bfloat16),
                preferred_element_type=jnp.float32) + b2_ref[...]
    h = jnp.maximum(h, 0.0)                                               # (48, bm)

    h = jnp.dot(w3_ref[...], h.astype(jnp.bfloat16),
                preferred_element_type=jnp.float32) + b3_ref[...]
    h = jnp.maximum(h, 0.0)                                               # (24, bm)

    # Output layer (1 x 24): VPU multiply + sublane reduce; saves one full MXU pass.
    out = jnp.sum(wo_t_ref[...] * h, axis=0, keepdims=True) + bo_ref[...]  # (1, bm) f32
    out_ref[...] = out[None].astype(out_ref.dtype)                         # (1, 1, bm)


def delay_predictor_nn3(x, params, *, bm=2048):
    """x: [B, input_dim] float32.  params: PyTorch-layout weights (out,in), biases (out,1)."""
    B, D = x.shape
    w1, b1 = params["w1"], params["b1"]
    w2, b2 = params["w2"], params["b2"]
    w3, b3 = params["w3"], params["b3"]
    wo, bo = params["wo"], params["bo"]
    assert w1.shape[1] == D

    # bf16 operands for the MXU layers (f32 accumulation happens in-kernel).  The output
    # layer weight stays f32 because it runs on the VPU; biases stay f32.
    w1b = w1.astype(jnp.bfloat16)
    w2b = w2.astype(jnp.bfloat16)
    w3b = w3.astype(jnp.bfloat16)
    wo_t = wo.reshape(H3, 1).astype(jnp.float32)        # (24, 1) column for VPU broadcast

    # Tile sizing: bm a multiple of 128 (lane width), no larger than needed for B.  On
    # multi-TensorCore parts make the grid length a multiple of the core count so the
    # ("parallel",) batch axis shards evenly; single-TC parts keep the largest bm.
    n_tc = _num_tensorcores()
    bm = _round_up(max(1, min(bm, B)), 128)
    if n_tc > 1 and B > 128 * n_tc:
        g = _round_up(pl.cdiv(B, bm), n_tc)
        bm = _round_up(pl.cdiv(B, g), 128)
    grid = (pl.cdiv(B, bm),)   # final block may be partial; its garbage tail is sliced off

    def full_spec(a):
        nd = a.ndim
        return pl.BlockSpec(a.shape, lambda i, _nd=nd: (0,) * _nd)

    in_specs = [pl.BlockSpec((bm, D), lambda i: (i, 0))] + [
        full_spec(a) for a in (w1b, b1, w2b, b2, w3b, b3, wo_t, bo)]
    out_spec = pl.BlockSpec((1, 1, bm), lambda i: (i, 0, 0))

    out = pl.pallas_call(
        _mlp_kernel,
        out_shape=jax.ShapeDtypeStruct((grid[0], 1, bm), jnp.float32),
        grid_spec=pltpu.PrefetchScalarGridSpec(
            num_scalar_prefetch=0,
            grid=grid,
            in_specs=in_specs,
            out_specs=out_spec,
        ),
        compiler_params=pltpu.CompilerParams(
            dimension_semantics=("parallel",)),
    )(x, w1b, b1, w2b, b2, w3b, b3, wo_t, bo)

    # (grid, 1, bm) -> (B, 1); batch row g*bm + j lives at out[g, 0, j].  Columns past B
    # in the last tile come from the partial input block (undefined) and are dropped here.
    return out.reshape(-1)[:B].reshape(B, 1)


def init_params(key, input_dim=INPUT_DIM):
    """PyTorch nn.Linear-style init: weights (out, in), biases (out, 1), U(-1/sqrt(fan_in), +)."""
    ks = jax.random.split(key, 8)

    def u(k, shape, fan_in):
        bound = float(1.0 / (fan_in ** 0.5))
        return jax.random.uniform(k, shape, jnp.float32, -bound, bound)

    return dict(
        w1=u(ks[0], (H1, input_dim), input_dim), b1=u(ks[1], (H1, 1), input_dim),
        w2=u(ks[2], (H2, H1), H1),               b2=u(ks[3], (H2, 1), H1),
        w3=u(ks[4], (H3, H2), H2),               b3=u(ks[5], (H3, 1), H2),
        wo=u(ks[6], (OUT, H3), H3),              bo=u(ks[7], (OUT, 1), H3),
    )


def reference_forward(x, p):
    """Plain-JAX f32 reference matching the PyTorch forward (eval mode: dropout = identity)."""
    h = jax.nn.relu(x @ p["w1"].T + p["b1"].T)
    h = jax.nn.relu(h @ p["w2"].T + p["b2"].T)
    h = jax.nn.relu(h @ p["w3"].T + p["b3"].T)
    return h @ p["wo"].T + p["bo"].T


if __name__ == "__main__":
    key = jax.random.PRNGKey(0)
    kx, kp = jax.random.split(key)

    B = 200                      # exercises the partial-final-block (no jnp.pad) path
    x = jax.random.normal(kx, (B, INPUT_DIM), jnp.float32)
    params = init_params(kp)

    out = delay_predictor_nn3(x, params)
    out = jax.block_until_ready(out)

    ref = reference_forward(x, params)
    assert out.shape == (B, 1)
    # Tolerance reflects bf16 matmul operands with f32 accumulation (K <= 96); real bugs
    # (wrong transpose / missing bias / missing ReLU) produce errors >> 3e-2.
    assert jnp.allclose(out, ref, atol=3e-2, rtol=3e-2), "mismatch vs f32 reference"

    print("KERNEL_OK")
</pallas_src>

<mosaic_0001>
module attributes {stable_mosaic.version = 11 : i64} {
  func.func @_mlp_kernel(%arg0: i32, %arg1: memref<256x32xf32, #tpu.memory_space<vmem>>, %arg2: memref<96x32xbf16, #tpu.memory_space<vmem>>, %arg3: memref<96x1xf32, #tpu.memory_space<vmem>>, %arg4: memref<48x96xbf16, #tpu.memory_space<vmem>>, %arg5: memref<48x1xf32, #tpu.memory_space<vmem>>, %arg6: memref<24x48xbf16, #tpu.memory_space<vmem>>, %arg7: memref<24x1xf32, #tpu.memory_space<vmem>>, %arg8: memref<24x1xf32, #tpu.memory_space<vmem>>, %arg9: memref<1x1xf32, #tpu.memory_space<vmem>>, %arg10: memref<1x1x256xf32, #tpu.memory_space<vmem>>) attributes {dimension_semantics = [#tpu.dimension_semantics<parallel>], iteration_bounds = array<i64: 1>, scalar_prefetch = 0 : i64, scratch_operands = 0 : i64, tpu.core_type = #tpu.core_type<tc>, window_params = [{transform_indices = @transform_0, window_bounds = array<i64: 256, 32>}, {pipeline_mode = #tpu.pipeline_mode<synchronous>, transform_indices = @transform_1, window_bounds = array<i64: 96, 32>}, {pipeline_mode = #tpu.pipeline_mode<synchronous>, transform_indices = @transform_2, window_bounds = array<i64: 96, 1>}, {pipeline_mode = #tpu.pipeline_mode<synchronous>, transform_indices = @transform_3, window_bounds = array<i64: 48, 96>}, {pipeline_mode = #tpu.pipeline_mode<synchronous>, transform_indices = @transform_4, window_bounds = array<i64: 48, 1>}, {pipeline_mode = #tpu.pipeline_mode<synchronous>, transform_indices = @transform_5, window_bounds = array<i64: 24, 48>}, {pipeline_mode = #tpu.pipeline_mode<synchronous>, transform_indices = @transform_6, window_bounds = array<i64: 24, 1>}, {pipeline_mode = #tpu.pipeline_mode<synchronous>, transform_indices = @transform_7, window_bounds = array<i64: 24, 1>}, {pipeline_mode = #tpu.pipeline_mode<synchronous>, transform_indices = @transform_8, window_bounds = array<i64: 1, 1>}, {transform_indices = @transform_9, window_bounds = array<i64: 1, 1, 256>}]} {
    %c0 = arith.constant 0 : index
    %c0_0 = arith.constant 0 : index
    %0 = vector.load %arg1[%c0, %c0_0] : memref<256x32xf32, #tpu.memory_space<vmem>>, vector<256x32xf32>
    %1 = arith.truncf %0 : vector<256x32xf32> to vector<256x32xbf16>
    %c0_1 = arith.constant 0 : index
    %c0_2 = arith.constant 0 : index
    %2 = vector.load %arg2[%c0_1, %c0_2] : memref<96x32xbf16, #tpu.memory_space<vmem>>, vector<96x32xbf16>
    %cst = arith.constant dense<0.000000e+00> : vector<96x256xf32>
    %3 = tpu.matmul %2, %1, %cst {dimension_numbers = #tpu.dot_dimension_numbers<[1], [1], [0], [0], [0, 0, 1, 0], [], []>} : vector<96x32xbf16>, vector<256x32xbf16>, vector<96x256xf32> -> vector<96x256xf32>
    %c0_3 = arith.constant 0 : index
    %c0_4 = arith.constant 0 : index
    %4 = vector.load %arg3[%c0_3, %c0_4] : memref<96x1xf32, #tpu.memory_space<vmem>>, vector<96x1xf32>
    %5 = vector.broadcast %4 : vector<96x1xf32> to vector<96x256xf32>
    %6 = arith.addf %3, %5 : vector<96x256xf32>
    %cst_5 = arith.constant 0.000000e+00 : f32
    %7 = vector.broadcast %cst_5 : f32 to vector<96x256xf32>
    %8 = arith.maximumf %6, %7 : vector<96x256xf32>
    %c0_6 = arith.constant 0 : index
    %c0_7 = arith.constant 0 : index
    %9 = vector.load %arg4[%c0_6, %c0_7] : memref<48x96xbf16, #tpu.memory_space<vmem>>, vector<48x96xbf16>
    %10 = arith.truncf %8 : vector<96x256xf32> to vector<96x256xbf16>
    %cst_8 = arith.constant dense<0.000000e+00> : vector<48x256xf32>
    %11 = tpu.matmul %9, %10, %cst_8 {dimension_numbers = #tpu.dot_dimension_numbers<[1], [0], [0], [1], [0, 0, 1, 1], [], []>} : vector<48x96xbf16>, vector<96x256xbf16>, vector<48x256xf32> -> vector<48x256xf32>
    %c0_9 = arith.constant 0 : index
    %c0_10 = arith.constant 0 : index
    %12 = vector.load %arg5[%c0_9, %c0_10] : memref<48x1xf32, #tpu.memory_space<vmem>>, vector<48x1xf32>
    %13 = vector.broadcast %12 : vector<48x1xf32> to vector<48x256xf32>
    %14 = arith.addf %11, %13 : vector<48x256xf32>
    %cst_11 = arith.constant 0.000000e+00 : f32
    %15 = vector.broadcast %cst_11 : f32 to vector<48x256xf32>
    %16 = arith.maximumf %14, %15 : vector<48x256xf32>
    %c0_12 = arith.constant 0 : index
    %c0_13 = arith.constant 0 : index
    %17 = vector.load %arg6[%c0_12, %c0_13] : memref<24x48xbf16, #tpu.memory_space<vmem>>, vector<24x48xbf16>
    %18 = arith.truncf %16 : vector<48x256xf32> to vector<48x256xbf16>
    %cst_14 = arith.constant dense<0.000000e+00> : vector<24x256xf32>
    %19 = tpu.matmul %17, %18, %cst_14 {dimension_numbers = #tpu.dot_dimension_numbers<[1], [0], [0], [1], [0, 0, 1, 1], [], []>} : vector<24x48xbf16>, vector<48x256xbf16>, vector<24x256xf32> -> vector<24x256xf32>
    %c0_15 = arith.constant 0 : index
    %c0_16 = arith.constant 0 : index
    %20 = vector.load %arg7[%c0_15, %c0_16] : memref<24x1xf32, #tpu.memory_space<vmem>>, vector<24x1xf32>
    %21 = vector.broadcast %20 : vector<24x1xf32> to vector<24x256xf32>
    %22 = arith.addf %19, %21 : vector<24x256xf32>
    %cst_17 = arith.constant 0.000000e+00 : f32
    %23 = vector.broadcast %cst_17 : f32 to vector<24x256xf32>
    %24 = arith.maximumf %22, %23 : vector<24x256xf32>
    %c0_18 = arith.constant 0 : index
    %c0_19 = arith.constant 0 : index
    %25 = vector.load %arg8[%c0_18, %c0_19] : memref<24x1xf32, #tpu.memory_space<vmem>>, vector<24x1xf32>
    %26 = vector.broadcast %25 : vector<24x1xf32> to vector<24x256xf32>
    %27 = arith.mulf %26, %24 : vector<24x256xf32>
    %cst_20 = arith.constant dense<0.000000e+00> : vector<256xf32>
    %28 = vector.multi_reduction <add>, %27, %cst_20 [0] : vector<24x256xf32> to vector<256xf32>
    %29 = vector.shape_cast %28 : vector<256xf32> to vector<1x256xf32>
    %c0_21 = arith.constant 0 : index
    %c0_22 = arith.constant 0 : index
    %30 = vector.load %arg9[%c0_21, %c0_22] : memref<1x1xf32, #tpu.memory_space<vmem>>, vector<1x1xf32>
    %31 = vector.broadcast %30 : vector<1x1xf32> to vector<1x256xf32>
    %32 = arith.addf %29, %31 : vector<1x256xf32>
    %33 = vector.shape_cast %32 : vector<1x256xf32> to vector<1x1x256xf32>
    %c0_23 = arith.constant 0 : index
    %c0_24 = arith.constant 0 : index
    %c0_25 = arith.constant 0 : index
    %34 = vector.load %arg10[%c0_23, %c0_24, %c0_25] : memref<1x1x256xf32, #tpu.memory_space<vmem>>, vector<1x1x256xf32>
    tpu.vector_store %arg10[%c0_23, %c0_24, %c0_25], %33 {strides = array<i32>} : memref<1x1x256xf32, #tpu.memory_space<vmem>>, vector<1x1x256xf32>,
    return
  }
  func.func @transform_0(%arg0: i32) -> (i32, i32) {
    %c0_i32 = arith.constant 0 : i32
    %c0_i32_0 = arith.constant 0 : i32
    return %arg0, %c0_i32 : i32, i32
  }
  func.func @transform_1(%arg0: i32) -> (i32, i32) {
    %c0_i32 = arith.constant 0 : i32
    %c0_i32_0 = arith.constant 0 : i32
    %c0_i32_1 = arith.constant 0 : i32
    return %c0_i32, %c0_i32_0 : i32, i32
  }
  func.func @transform_2(%arg0: i32) -> (i32, i32) {
    %c0_i32 = arith.constant 0 : i32
    %c0_i32_0 = arith.constant 0 : i32
    %c0_i32_1 = arith.constant 0 : i32
    return %c0_i32, %c0_i32_0 : i32, i32
  }
  func.func @transform_3(%arg0: i32) -> (i32, i32) {
    %c0_i32 = arith.constant 0 : i32
    %c0_i32_0 = arith.constant 0 : i32
    %c0_i32_1 = arith.constant 0 : i32
    return %c0_i32, %c0_i32_0 : i32, i32
  }
  func.func @transform_4(%arg0: i32) -> (i32, i32) {
    %c0_i32 = arith.constant 0 : i32
    %c0_i32_0 = arith.constant 0 : i32
    %c0_i32_1 = arith.constant 0 : i32
    return %c0_i32, %c0_i32_0 : i32, i32
  }
  func.func @transform_5(%arg0: i32) -> (i32, i32) {
    %c0_i32 = arith.constant 0 : i32
    %c0_i32_0 = arith.constant 0 : i32
    %c0_i32_1 = arith.constant 0 : i32
    return %c0_i32, %c0_i32_0 : i32, i32
  }
  func.func @transform_6(%arg0: i32) -> (i32, i32) {
    %c0_i32 = arith.constant 0 : i32
    %c0_i32_0 = arith.constant 0 : i32
    %c0_i32_1 = arith.constant 0 : i32
    return %c0_i32, %c0_i32_0 : i32, i32
  }
  func.func @transform_7(%arg0: i32) -> (i32, i32) {
    %c0_i32 = arith.constant 0 : i32
    %c0_i32_0 = arith.constant 0 : i32
    %c0_i32_1 = arith.constant 0 : i32
    return %c0_i32, %c0_i32_0 : i32, i32
  }
  func.func @transform_8(%arg0: i32) -> (i32, i32) {
    %c0_i32 = arith.constant 0 : i32
    %c0_i32_0 = arith.constant 0 : i32
    %c0_i32_1 = arith.constant 0 : i32
    return %c0_i32, %c0_i32_0 : i32, i32
  }
  func.func @transform_9(%arg0: i32) -> (i32, i32, i32) {
    %c0_i32 = arith.constant 0 : i32
    %c0_i32_0 = arith.constant 0 : i32
    %c0_i32_1 = arith.constant 0 : i32
    return %arg0, %c0_i32, %c0_i32_0 : i32, i32, i32
  }
}

</mosaic_0001>

<bundles_post_ra>
// kernel: tpu_custom_call.1
= control target key start
LH: loop header
LB: loop body
LE: loop exit
PB: predicated region body
PF: predicated region fallthrough
CT: control target
= control target key end

     0   :  { %s1140_s0 = inlined_call_operand.vmem [shape: f32[200,32], index: 0, kind: input, shape index: {}]   ;;  %s1141_s1 = inlined_call_operand.vmem [shape: bf16[96,32], index: 1, kind: input, shape index: {}]   ;;  %s1142_s2 = inlined_call_operand.vmem [shape: f32[96,1], index: 2, kind: input, shape index: {}]   ;;  %s1143_s3 = inlined_call_operand.vmem [shape: bf16[48,96], index: 3, kind: input, shape index: {}]   ;;  %s1144_s4 = inlined_call_operand.vmem [shape: f32[48,1], index: 4, kind: input, shape index: {}]   ;;  %s1145_s5 = inlined_call_operand.vmem [shape: bf16[24,48], index: 5, kind: input, shape index: {}]   ;;  %s1146_s6 = inlined_call_operand.vmem [shape: f32[24,1], index: 6, kind: input, shape index: {}]   ;;  %s1147_s7 = inlined_call_operand.vmem [shape: f32[24,1], index: 7, kind: input, shape index: {}]   ;;  %s1148_s8 = inlined_call_operand.<no memory space> [shape: f32[1,1], index: 8, kind: input, shape index: {}]   ;;  %s1149_s9 = inlined_call_operand.hbm [shape: f32[1,1,256], index: 9, kind: output, shape index: {}]  }
   0x1   :  { %v14_v0 = vstv %s1148_s8 }
   0x2   :  { %15 = vst [vmem:[#allocation2] sm:$0x1] %v14_v0 }
   0x3   :  { %v66_v1 = vld [vmem:[%s1140_s0 + $0xf0] sm:$0xff]  ;;  %v67_v2 = vld [vmem:[%s1140_s0 + $0xf8] sm:$0xff]  ;;  %vm198_vm0 = vcmask 261120   ;;  %v64_v6 = vld [vmem:[%s1140_s0 + $0xe0] sm:$0xff]  ;;  %v820_v8 = vmov 0  }
   0x4   :  { %v50_v3 = vld [vmem:[%s1140_s0 + $0x70] sm:$0xff]  ;;  %v83_v4 = vpack.c.bf16 %v67_v2, %v66_v1  ;;  %v51_v5 = vld [vmem:[%s1140_s0 + $0x78] sm:$0xff]  ;;  %v65_v7 = vld [vmem:[%s1140_s0 + $0xe8] sm:$0xff]  ;;  %785 = vset.pattern.permute.xlu0 %v820_v8  ;;  %786 = vset.pattern.permute.xlu1 %v820_v8 }
   0x5   :  { %v75_v9 = vpack.c.bf16 %v51_v5, %v50_v3  ;;  %v82_v10 = vpack.c.bf16 %v65_v7, %v64_v6  ;;  %493 = vmatprep.mubr.bf16.mxu1 %v820_v8  ;;  %v48_v11 = vld [vmem:[%s1140_s0 + $0x60] sm:$0xff]  ;;  %v49_v12 = vld [vmem:[%s1140_s0 + $0x68] sm:$0xff]  ;;  %v62_v15 = vld [vmem:[%s1140_s0 + $0xd0] sm:$0xff] }
   0x6   :  { %774 = vmatprep.subr.msk.bf16.mxu0 %vm198_vm0, %v83_v4  ;;  %v74_v14 = vpack.c.bf16 %v49_v12, %v48_v11  ;;  %v63_v16 = vld [vmem:[%s1140_s0 + $0xd8] sm:$0xff]  ;;  %v46_v19 = vld [vmem:[%s1140_s0 + $0x50] sm:$0xff]  ;;  %v922_v21 = vld [vmem:[%s1141_s1] sm:$0xff]  }
   0x7   :  { %v239_v13 = vsel %vm198_vm0, %v75_v9, 0  ;;  %v81_v18 = vpack.c.bf16 %v63_v16, %v62_v15  ;;  %v47_v20 = vld [vmem:[%s1140_s0 + $0x58] sm:$0xff]  ;;  %762 = vmatprep.mubr.msk.bf16.mxu0 %vm198_vm0, %v922_v21  ;;  %v60_v23 = vld [vmem:[%s1140_s0 + $0xc0] sm:$0xff]  ;;  %v61_v24 = vld [vmem:[%s1140_s0 + $0xc8] sm:$0xff] }
   0x8   :  { %747 = vmatpush3.bf16.xpose.msra.mxu0 %v239_v13  ;;  %v236_v17 = vsel %vm198_vm0, %v74_v14, 0  ;;  %v73_v22 = vpack.c.bf16 %v47_v20, %v46_v19  ;;  %v106_v25 = vld [vmem:[%s1142_s2 + $0x50] sm:$0xff]  ;;  %v44_v26 = vld [vmem:[%s1140_s0 + $0x40] sm:$0xff]  ;;  %v45_v27 = vld [vmem:[%s1140_s0 + $0x48] sm:$0xff]  ;;  %v80_v30 = vpack.c.bf16 %v61_v24, %v60_v23 }
   0x9   :  { %775 = vmatprep.subr.msk.bf16.mxu0 %vm198_vm0, %v82_v10  ;;  %160 = vperm.xlu0 %785, %v106_v25   ;;  %v104_v28 = vld [vmem:[%s1142_s2 + $0x40] sm:$0xff]  ;;  %v107_v31 = vld [vmem:[%s1142_s2 + $0x58] sm:$0xff]  ;;  %v105_v32 = vld [vmem:[%s1142_s2 + $0x48] sm:$0xff]  ;;  %v72_v33 = vpack.c.bf16 %v45_v27, %v44_v26 }
   0xa   :  { %v233_v29 = vsel %vm198_vm0, %v73_v22, 0  ;;  %150 = vperm.xlu1 %786, %v104_v28   ;;  %v102_v34 = vld [vmem:[%s1142_s2 + $0x30] sm:$0xff]  ;;  %v59_v36 = vld [vmem:[%s1140_s0 + $0xb8] sm:$0xff]  ;;  %v100_v39 = vld [vmem:[%s1142_s2 + $0x20] sm:$0xff] }
   0xb   :  { %v58_v35 = vld [vmem:[%s1140_s0 + $0xb0] sm:$0xff]  ;;  %v103_v37 = vld [vmem:[%s1142_s2 + $0x38] sm:$0xff]  ;;  %v230_v38 = vsel %vm198_vm0, %v72_v33, 0  ;;  %v101_v42 = vld [vmem:[%s1142_s2 + $0x28] sm:$0xff] }
   0xc   :  { %v42_v40 = vld [vmem:[%s1140_s0 + $0x30] sm:$0xff]  ;;  %v43_v41 = vld [vmem:[%s1140_s0 + $0x38] sm:$0xff]  ;;  %v79_v43 = vpack.c.bf16 %v59_v36, %v58_v35 }
   0xd   :  { %165 = vperm.xlu0 %785, %v107_v31  }
   0xe   :  { %155 = vperm.xlu1 %786, %v105_v32  }
  0x10   :  { %749 = vmatpush3.bf16.xpose.msra.mxu0 %v236_v17 }
  0x11   :  { %776 = vmatprep.subr.msk.bf16.mxu0 %vm198_vm0, %v81_v18  ;;  %140 = vperm.xlu0 %785, %v102_v34  }
  0x12   :  { %145 = vperm.xlu1 %786, %v103_v37  }
  0x18   :  { %751 = vmatpush3.bf16.xpose.msra.mxu0 %v233_v29 }
  0x19   :  { %777 = vmatprep.subr.msk.bf16.mxu0 %vm198_vm0, %v80_v30 }
  0x1a   :  { %16 = vsyncpa [#allocation4], 0  ;;  %130 = vperm.xlu0 %785, %v100_v39   ;;  %v71_v44 = vpack.c.bf16 %v43_v41, %v42_v40  ;;  %135 = vperm.xlu1 %786, %v101_v42   ;;  %v98_v45 = vld [vmem:[%s1142_s2 + $0x10] sm:$0xff]  ;;  %v56_v46 = vld [vmem:[%s1140_s0 + $0xa0] sm:$0xff]  ;;  %vm451_vm1 = vcmask 785408   ;;  %vm571_vm2 = vcmask 392192  }
  0x1b   :  { %v57_v47 = vld [vmem:[%s1140_s0 + $0xa8] sm:$0xff]  ;;  %v99_v48 = vld [vmem:[%s1142_s2 + $0x18] sm:$0xff]  ;;  %v96_v51 = vld [vmem:[%s1142_s2] sm:$0xff] }
  0x1c   :  { %v227_v49 = vsel %vm198_vm0, %v71_v44, 0  ;;  %v78_v50 = vpack.c.bf16 %v57_v47, %v56_v46  ;;  %v40_v52 = vld [vmem:[%s1140_s0 + $0x20] sm:$0xff]  ;;  %v41_v53 = vld [vmem:[%s1140_s0 + $0x28] sm:$0xff]  ;;  %v54_v57 = vld [vmem:[%s1140_s0 + $0x90] sm:$0xff] }
  0x1d   :  { %v97_v54 = vld [vmem:[%s1142_s2 + $0x8] sm:$0xff]  ;;  %v70_v55 = vpack.c.bf16 %v41_v53, %v40_v52  ;;  %v404_v56 = vld [vmem:[%s1144_s4 + $0x20] sm:$0xff]  ;;  %v55_v58 = vld [vmem:[%s1140_s0 + $0x98] sm:$0xff] }
  0x1e   :  { %120 = vperm.xlu0 %785, %v98_v45   ;;  %125 = vperm.xlu1 %786, %v99_v48   ;;  %v405_v59 = vld [vmem:[%s1144_s4 + $0x28] sm:$0xff]  ;;  %v77_v61 = vpack.c.bf16 %v55_v58, %v54_v57  ;;  %v402_v62 = vld [vmem:[%s1144_s4 + $0x10] sm:$0xff]  ;;  %v39_v0 = vld [vmem:[%s1140_s0 + $0x18] sm:$0xff] }
  0x1f   :  { %v224_v60 = vsel %vm198_vm0, %v70_v55, 0  ;;  %v38_v63 = vld [vmem:[%s1140_s0 + $0x10] sm:$0xff]  ;;  %v403_v1 = vld [vmem:[%s1144_s4 + $0x18] sm:$0xff]  ;;  %v400_v3 = vld [vmem:[%s1144_s4] sm:$0xff] }
  0x20   :  { %753 = vmatpush3.bf16.xpose.msra.mxu0 %v230_v38  ;;  %v69_v2 = vpack.c.bf16 %v39_v0, %v38_v63  ;;  %v52_v4 = vld [vmem:[%s1140_s0 + $0x80] sm:$0xff]  ;;  %v53_v5 = vld [vmem:[%s1140_s0 + $0x88] sm:$0xff]  ;;  %v547_v15 = vld [vmem:[%s1146_s6 + $0x10] sm:$0xff] }
  0x21   :  { %778 = vmatprep.subr.msk.bf16.mxu0 %vm198_vm0, %v79_v43  ;;  %v401_v6 = vld [vmem:[%s1144_s4 + $0x8] sm:$0xff]  ;;  %v76_v9 = vpack.c.bf16 %v53_v5, %v52_v4  ;;  %v545_v10 = vld [vmem:[%s1146_s6] sm:$0xff]  ;;  %v637_v19 = vld [vmem:[%s1147_s7 + $0x10] sm:$0xff] }
  0x22   :  { %110 = vperm.xlu0 %785, %v96_v51   ;;  %115 = vperm.xlu1 %786, %v97_v54   ;;  %v221_v7 = vsel %vm198_vm0, %v69_v2, 0  ;;  %v36_v11 = vld [vmem:[%s1140_s0] sm:$0xff]  ;;  %v37_v12 = vld [vmem:[%s1140_s0 + $0x8] sm:$0xff]  ;;  %v789_v23 = vld [vmem:[%s1141_s1 + $0x10] sm:$0xff]  }
  0x23   :  { %v546_v13 = vld [vmem:[%s1146_s6 + $0x8] sm:$0xff]  ;;  %v68_v14 = vpack.c.bf16 %v37_v12, %v36_v11  ;;  %v635_v16 = vld [vmem:[%s1147_s7] sm:$0xff]  ;;  %v790_v24 = vld [vmem:[%s1141_s1 + $0x18] sm:$0xff]  }
  0x24   :  { %v636_v18 = vld [vmem:[%s1147_s7 + $0x8] sm:$0xff]  ;;  %v675_v20 = vld [vmem:[#allocation2] sm:$0x1] }
  0x25   :  { %v218_v17 = vsel %vm198_vm0, %v68_v14, 0  ;;  %v788_v22 = vld [vmem:[%s1141_s1 + $0x8] sm:$0xff]  }
  0x26   :  { %428 = vperm.xlu0 %785, %v404_v56   ;;  %433 = vperm.xlu1 %786, %v405_v59   ;;  %v792_v25 = vld [vmem:[%s1141_s1 + $0x28] sm:$0xff]  }
  0x28   :  { %755 = vmatpush3.bf16.xpose.msra.mxu0 %v227_v49 }
  0x29   :  { %779 = vmatprep.subr.msk.bf16.mxu0 %vm198_vm0, %v78_v50 }
  0x2a   :  { %418 = vperm.xlu0 %785, %v402_v62   ;;  %423 = vperm.xlu1 %786, %v403_v1  }
  0x2e   :  { %408 = vperm.xlu0 %785, %v400_v3   ;;  %413 = vperm.xlu1 %786, %v401_v6  }
  0x30   :  { %757 = vmatpush3.bf16.xpose.msra.mxu0 %v224_v60 }
  0x31   :  { %780 = vmatprep.subr.msk.bf16.mxu0 %vm198_vm0, %v77_v61 }
  0x32   :  { %550 = vperm.xlu0 %785, %v545_v10   ;;  %555 = vperm.xlu1 %786, %v546_v13  }
  0x36   :  { %560 = vperm.xlu0 %785, %v547_v15   ;;  %640 = vperm.xlu1 %786, %v635_v16  }
  0x38   :  { %759 = vmatpush3.bf16.xpose.msra.mxu0 %v221_v7 }
  0x39   :  { %781 = vmatprep.subr.msk.bf16.mxu0 %vm198_vm0, %v76_v9 }
  0x3a   :  { %645 = vperm.xlu0 %785, %v636_v18   ;;  %650 = vperm.xlu1 %786, %v637_v19  }
  0x3e   :  { %678 = vperm.xlu0 %785, %v675_v20  }
  0x40   :  { %761 = vmatpush3.bf16.xpose.msra.mxu0 %v218_v17 }
  0x47   :  { %763 = vmatmul.mubr.msk.bf16.vlgmr.msra.gmra.mxu0 %vm198_vm0, %v922_v21  ;;  %v791_v21 = vld [vmem:[%s1141_s1 + $0x20] sm:$0xff]  }
  0x48   :  { %764 = vmatprep.mubr.msk.bf16.mxu0 %vm198_vm0, %v788_v22 }
  0x4f   :  { %765 = vmatmul.mubr.msk.bf16.gmra.mxu0 %vm198_vm0, %v788_v22 }
  0x50   :  { %766 = vmatprep.mubr.msk.bf16.mxu0 %vm198_vm0, %v789_v23 }
  0x57   :  { %767 = vmatmul.mubr.msk.bf16.gmra.mxu0 %vm198_vm0, %v789_v23 }
  0x58   :  { %768 = vmatprep.mubr.msk.bf16.mxu0 %vm198_vm0, %v790_v24 }
  0x5f   :  { %769 = vmatmul.mubr.msk.bf16.gmra.mxu0 %vm198_vm0, %v790_v24 }
  0x60   :  { %770 = vmatprep.mubr.msk.bf16.mxu0 %vm198_vm0, %v791_v21 }
  0x67   :  { %771 = vmatmul.mubr.msk.bf16.gmra.mxu0 %vm198_vm0, %v791_v21 }
  0x68   :  { %772 = vmatprep.mubr.msk.bf16.mxu0 %vm198_vm0, %v792_v25 }
  0x6f   :  { %773 = vmatmul.mubr.msk.bf16.gmra.mxu0 %vm198_vm0, %v792_v25 }
  0x84   :  { %v161_v43 = vpop.permute.xlu0 %160 }
  0x85   :  { %v151_v41 = vpop.permute.xlu1 %150 }
  0x88   :  { %v166_v48 = vpop.permute.xlu0 %165 }
  0x89   :  { %v156_v46 = vpop.permute.xlu1 %155 }
  0x8c   :  { %v141_v53 = vpop.permute.xlu0 %140 }
  0x8d   :  { %v146_v51 = vpop.permute.xlu1 %145 }
  0x95   :  { %v136_v62 = vpop.permute.xlu1 %135  ;;  %v131_v5 = vpop.permute.xlu0 %130 }
  0x99   :  { %v126_v18 = vpop.permute.xlu1 %125  ;;  %v121_v24 = vpop.permute.xlu0 %120 }
 0x107   :  { %v1097_v26 = vpop.f32.mrf.mxu0 }
 0x109   :  { %v1099_v27 = vpop.f32.mrf.mxu0 }
 0x10b   :  { %v1101_v28 = vpop.f32.mrf.mxu0 }
 0x10d   :  { %v1103_v29 = vpop.f32.mrf.mxu0 }
 0x10f   :  { %v1105_v30 = vpop.f32.mrf.mxu0 }
 0x111   :  { %v1107_v31 = vpop.f32.mrf.mxu0 }
 0x113   :  { %v1109_v32 = vpop.f32.mrf.mxu0 }
 0x115   :  { %v315_v33 = vpop.f32.mrf.mxu0 }
 0x117   :  { %v319_v34 = vpop.f32.mrf.mxu0 }
 0x119   :  { %v321_v35 = vpop.f32.mrf.mxu0 }
 0x11a   :  { %v322_v22 = vadd.f32 %v321_v35, %v131_v5 }
 0x11b   :  { %v323_v36 = vpop.f32.mrf.mxu0 }
 0x11c   :  { %v324_v21 = vadd.f32 %v323_v36, %v136_v62 }
 0x11d   :  { %v325_v37 = vpop.f32.mrf.mxu0 }
 0x11e   :  { %v326_v15 = vadd.f32 %v325_v37, %v136_v62  ;;  %v312_v37 = vadd.f32 %v1107_v31, %v121_v24  ;;  %v368_v35 = vmax.f32 %v324_v21, 0.0 }
 0x11f   :  { %v329_v38 = vpop.f32.mrf.mxu0 }
 0x120   :  { %v330_v19 = vadd.f32 %v329_v38, %v141_v53  ;;  %v116_v38 = vpop.permute.xlu1 %115 }
 0x121   :  { %v331_v39 = vpop.f32.mrf.mxu0  ;;  %v304_v31 = vadd.f32 %v1101_v28, %v116_v38  ;;  %v793_v28 = vld [vmem:[%s1143_s3] sm:$0xff]  }
 0x122   :  { %v332_v9 = vadd.f32 %v331_v39, %v141_v53 }
 0x123   :  { %v333_v40 = vpop.f32.mrf.mxu0 }
 0x124   :  { %v334_v12 = vadd.f32 %v333_v40, %v146_v51  ;;  %v371_v23 = vmax.f32 %v332_v9, 0.0 }
 0x125   :  { %v335_v42 = vpop.f32.mrf.mxu0 }
 0x126   :  { %v336_v1 = vadd.f32 %v335_v42, %v146_v51  ;;  %v372_v25 = vmax.f32 %v334_v12, 0.0  ;;  %v369_v42 = vmax.f32 %v326_v15, 0.0 }
 0x127   :  { %v339_v44 = vpop.f32.mrf.mxu0 }
 0x128   :  { %v340_v6 = vadd.f32 %v339_v44, %v151_v41  ;;  %v373_v16 = vmax.f32 %v336_v1, 0.0  ;;  %v370_v44 = vmax.f32 %v330_v19, 0.0 }
 0x129   :  { %v341_v45 = vpop.f32.mrf.mxu0 }
 0x12a   :  { %v342_v60 = vadd.f32 %v341_v45, %v151_v41  ;;  %v374_v20 = vmax.f32 %v340_v6, 0.0  ;;  %v316_v41 = vadd.f32 %v315_v33, %v126_v18  ;;  %v395_v40 = vpack.c.bf16 %v373_v16, %v371_v23 }
 0x12b   :  { %v343_v47 = vpop.f32.mrf.mxu0  ;;  %v367_v45 = vmax.f32 %v322_v22, 0.0  ;;  %v310_v33 = vadd.f32 %v1105_v30, %v121_v24 }
 0x12c   :  { %v344_v63 = vadd.f32 %v343_v47, %v156_v46  ;;  %v375_v10 = vmax.f32 %v342_v60, 0.0  ;;  %v394_v47 = vpack.c.bf16 %v372_v25, %v370_v44  ;;  %v365_v36 = vmax.f32 %v316_v41, 0.0 }
 0x12d   :  { %v345_v49 = vpop.f32.mrf.mxu0 }
 0x12e   :  { %v346_v55 = vadd.f32 %v345_v49, %v156_v46  ;;  %v376_v13 = vmax.f32 %v344_v63, 0.0  ;;  %v314_v46 = vadd.f32 %v1109_v32, %v126_v18  ;;  %v393_v49 = vpack.c.bf16 %v369_v42, %v367_v45 }
 0x12f   :  { %v349_v50 = vpop.f32.mrf.mxu0 }
 0x130   :  { %v350_v58 = vadd.f32 %v349_v50, %v161_v43  ;;  %v377_v2 = vmax.f32 %v346_v55, 0.0  ;;  %v396_v39 = vpack.c.bf16 %v376_v13, %v374_v20  ;;  %v111_v50 = vpop.permute.xlu0 %110  ;;  %v364_v53 = vmax.f32 %v314_v46, 0.0 }
 0x131   :  { %v351_v52 = vpop.f32.mrf.mxu0 }
 0x132   :  { %v352_v56 = vadd.f32 %v351_v52, %v161_v43  ;;  %v378_v7 = vmax.f32 %v350_v58, 0.0  ;;  %v397_v17 = vpack.c.bf16 %v377_v2, %v375_v10  ;;  %v320_v43 = vadd.f32 %v319_v34, %v131_v5 }
 0x133   :  { %v353_v54 = vpop.f32.mrf.mxu0  ;;  %v302_v34 = vadd.f32 %v1099_v27, %v111_v50  ;;  %v363_v52 = vmax.f32 %v312_v37, 0.0  ;;  %v360_v58 = vmax.f32 %v304_v31, 0.0 }
 0x134   :  { %v354_v57 = vadd.f32 %v353_v54, %v166_v48  ;;  %v379_v3 = vmax.f32 %v352_v56, 0.0  ;;  %v366_v51 = vmax.f32 %v320_v43, 0.0  ;;  %v300_v56 = vadd.f32 %v1097_v26, %v111_v50  ;;  %v794_v26 = vld [vmem:[%s1143_s3 + $0x8] sm:$0xff]   ;;  %v429_v6 = vpop.permute.xlu0 %428 }
 0x135   :  { %v355_v59 = vpop.f32.mrf.mxu0  ;;  %v391_v55 = vpack.c.bf16 %v365_v36, %v363_v52 }
 0x136   :  { %v356_v61 = vadd.f32 %v355_v59, %v166_v48  ;;  %v380_v0 = vmax.f32 %v354_v57, 0.0  ;;  %v306_v48 = vadd.f32 %v1103_v29, %v116_v38  ;;  %v392_v54 = vpack.c.bf16 %v368_v35, %v366_v51 }
 0x137   :  { %v362_v29 = vmax.f32 %v310_v33, 0.0  ;;  %v359_v57 = vmax.f32 %v302_v34, 0.0  ;;  %v358_v60 = vmax.f32 %v300_v56, 0.0 }
 0x138   :  { %v381_v4 = vmax.f32 %v356_v61, 0.0  ;;  %v398_v14 = vpack.c.bf16 %v380_v0, %v378_v7  ;;  %v361_v32 = vmax.f32 %v306_v48, 0.0  ;;  %v795_v61 = vld [vmem:[%s1143_s3 + $0x10] sm:$0xff]   ;;  %v419_v12 = vpop.permute.xlu0 %418 }
 0x139   :  { %v390_v30 = vpack.c.bf16 %v364_v53, %v362_v29  ;;  %v388_v27 = vpack.c.bf16 %v360_v58, %v358_v60  ;;  %v796_v53 = vld [vmem:[%s1145_s5] sm:$0xff]  }
 0x13a   :  { %v399_v11 = vpack.c.bf16 %v381_v4, %v379_v3  ;;  %v389_v59 = vpack.c.bf16 %v361_v32, %v359_v57  ;;  %v434_v4 = vpop.permute.xlu1 %433 }
 0x13c   :  { %465 = vmatprep.subr.bf16.mxu1 %v399_v11  ;;  %v409_v42 = vpop.permute.xlu0 %408 }
 0x13d   :  { %466 = vmatpush1.bf16.msra.mxu1 %v398_v14 }
 0x13e   :  { %467 = vmatprep.subr.bf16.mxu1 %v397_v17  ;;  %v424_v10 = vpop.permute.xlu1 %423 }
 0x140   :  { %v551_v32 = vpop.permute.xlu0 %550 }
 0x141   :  { %468 = vmatpush1.bf16.msra.mxu1 %v396_v39 }
 0x142   :  { %469 = vmatprep.subr.bf16.mxu1 %v395_v40  ;;  %v414_v22 = vpop.permute.xlu1 %413 }
 0x144   :  { %v561_v29 = vpop.permute.xlu0 %560 }
 0x145   :  { %470 = vmatpush1.bf16.msra.mxu1 %v394_v47 }
 0x146   :  { %471 = vmatprep.subr.bf16.mxu1 %v393_v49 }
 0x149   :  { %472 = vmatpush1.bf16.msra.mxu1 %v392_v54  ;;  %v797_v54 = vld [vmem:[%s1145_s5 + $0x8] ss:$0 sps:$4 sm:$0xff]   ;;  %s822_s5 = smov [#allocation3]  }
 0x14a   :  { %473 = vmatprep.subr.bf16.mxu1 %v391_v55  ;;  %v556_v55 = vpop.permute.xlu1 %555  ;;  %s716_s25 = sshll.u32 %s822_s5, 4  ;;  %s717_s25 = int_to_ptr.vmem [resolvable:$true] %s716_s25 }
 0x14b   :  { %s798_s4 = scalar_lea.vmem %s717_s25, 32  ;;  %p803_p1 = scmp.lt.s32.totalorder %s717_s25, %s717_s25 }
 0x14c   :  { %p799_p0 = scmp.ne.s32.totalorder %s717_s25, %s798_s4  ;;  %p804_p2 = scmp.lt.s32.totalorder %s798_s4, %s798_s4 }
 0x14d   :  { %474 = vmatpush1.bf16.msra.mxu1 %v390_v30 }
 0x14e   :  { %475 = vmatprep.subr.bf16.mxu1 %v389_v59  ;;  %p805_p3 = por %p804_p2, %p803_p1 }
 0x150   :  { %p806_p4 = pnand %p805_p3, %p799_p0 }
 0x151   :  { %476 = vmatpush1.bf16.msra.mxu1 %v388_v27  ;;  %v641_v27 = vpop.permute.xlu1 %640 }
 0x154   :  { %739 = vmatmul.mubr.msk.bf16.vlgmr.msra.gmra.mxu1 %vm451_vm1, %v793_v28 }
 0x155   :  { %503 = vmatprep.mubr.bf16.mxu1 %v820_v8 }
 0x15c   :  { %740 = vmatmul.mubr.msk.bf16.gmra.mxu1 %vm451_vm1, %v794_v26 }
 0x15d   :  { %513 = vmatprep.mubr.bf16.mxu1 %v820_v8 }
 0x164   :  { %741 = vmatmul.mubr.msk.bf16.gmra.mxu1 %vm451_vm1, %v795_v61 }
 0x165   :  { %610 = vmatprep.mubr.bf16.mxu1 %v820_v8 }
 0x214   :  { %v495_v62 = vpop.f32.mrf.mxu1 }
 0x215   :  { %v496_v36 = vadd.f32 %v495_v62, %v409_v42 }
 0x216   :  { %v497_v63 = vpop.f32.mrf.mxu1 }
 0x217   :  { %v498_v44 = vadd.f32 %v497_v63, %v409_v42  ;;  %v524_v52 = vmax.f32 %v496_v36, 0.0 }
 0x218   :  { %v499_v0 = vpop.f32.mrf.mxu1 }
 0x219   :  { %v500_v38 = vadd.f32 %v499_v0, %v414_v22  ;;  %v525_v50 = vmax.f32 %v498_v44, 0.0 }
 0x21a   :  { %v501_v1 = vpop.f32.mrf.mxu1 }
 0x21b   :  { %v502_v21 = vadd.f32 %v501_v1, %v414_v22  ;;  %v526_v33 = vmax.f32 %v500_v38, 0.0 }
 0x21c   :  { %v505_v2 = vpop.f32.mrf.mxu1 }
 0x21d   :  { %v506_v40 = vadd.f32 %v505_v2, %v419_v12  ;;  %v527_v47 = vmax.f32 %v502_v21, 0.0  ;;  %v539_v31 = vpack.c.bf16 %v526_v33, %v524_v52 }
 0x21e   :  { %v507_v3 = vpop.f32.mrf.mxu1 }
 0x21f   :  { %v508_v19 = vadd.f32 %v507_v3, %v419_v12  ;;  %v528_v49 = vmax.f32 %v506_v40, 0.0  ;;  %v540_v34 = vpack.c.bf16 %v527_v47, %v525_v50 }
 0x220   :  { %v509_v5 = vpop.f32.mrf.mxu1 }
 0x221   :  { %v510_v23 = vadd.f32 %v509_v5, %v424_v10  ;;  %v529_v37 = vmax.f32 %v508_v19, 0.0 }
 0x222   :  { %v511_v7 = vpop.f32.mrf.mxu1 }
 0x223   :  { %v512_v14 = vadd.f32 %v511_v7, %v424_v10  ;;  %v530_v46 = vmax.f32 %v510_v23, 0.0  ;;  %v651_v10 = vpop.permute.xlu1 %650 }
 0x224   :  { %v515_v9 = vpop.f32.mrf.mxu1 }
 0x225   :  { %v516_v17 = vadd.f32 %v515_v9, %v429_v6  ;;  %v531_v25 = vmax.f32 %v512_v14, 0.0  ;;  %v541_v51 = vpack.c.bf16 %v530_v46, %v528_v49 }
 0x226   :  { %v517_v11 = vpop.f32.mrf.mxu1 }
 0x227   :  { %v518_v15 = vadd.f32 %v517_v11, %v429_v6  ;;  %v532_v43 = vmax.f32 %v516_v17, 0.0  ;;  %v542_v48 = vpack.c.bf16 %v531_v25, %v529_v37 }
 0x228   :  { %v519_v13 = vpop.f32.mrf.mxu1 }
 0x229   :  { %v520_v16 = vadd.f32 %v519_v13, %v434_v4  ;;  %v533_v39 = vmax.f32 %v518_v15, 0.0 }
 0x22a   :  { %v521_v18 = vpop.f32.mrf.mxu1 }
 0x22b   :  { %v522_v20 = vadd.f32 %v521_v18, %v434_v4  ;;  %v534_v24 = vmax.f32 %v520_v16, 0.0 }
 0x22d   :  { %v535_v41 = vmax.f32 %v522_v20, 0.0  ;;  %v543_v35 = vpack.c.bf16 %v534_v24, %v532_v43  ;;  %v681_v20 = vlaneseq  ;;  %v821_v43 = vmov 1966171168  }
 0x22e   :  { %v691_v44 = vunpack.c.l.s4 %v821_v43 }
 0x22f   :  { %v544_v45 = vpack.c.bf16 %v535_v41, %v533_v39  ;;  %v682_v25 = vshrl.u32 %v681_v20, 7  ;;  %vm707_vm3 = vcmp.lt.s32.totalorder %v681_v20, 256 }
 0x231   :  { %588 = vmatprep.subr.bf16.mxu1 %v544_v45  ;;  %v683_v37 = vsub.s32 0, %v682_v25 }
 0x232   :  { %589 = vmatpush1.bf16.msra.mxu1 %v543_v35 }
 0x233   :  { %590 = vmatprep.subr.bf16.mxu1 %v542_v48  ;;  %v692_v48 = vunpack.c.0.s8 %v691_v44 }
 0x236   :  { %591 = vmatpush1.bf16.msra.mxu1 %v541_v51  ;;  %v695_v51 = vsub.s32 %v692_v48, %v682_v25 }
 0x237   :  { %592 = vmatprep.subr.bf16.mxu1 %v540_v34 }
 0x23a   :  { %593 = vmatpush1.bf16.msra.mxu1 %v539_v31 }
 0x23d   :  { %744 = vmatmul.mubr.msk.bf16.vlgmr.msra.gmra.mxu1 %vm571_vm2, %v796_v53 }
 0x23e   :  { %620 = vmatprep.mubr.bf16.mxu1 %v820_v8  ;;  %v646_v8 = vpop.permute.xlu0 %645 }
 0x242   :  { %v679_v46 = vpop.permute.xlu0 %678 }
 0x243   :  { %v684_v36 = vrot.slane %v679_v46, %v683_v37 }
 0x245   :  { %745 = vmatmul.mubr.msk.bf16.gmra.mxu1 %vm571_vm2, %v797_v54 }
 0x2fd   :  { %v612_v56 = vpop.f32.mrf.mxu1 }
 0x2fe   :  { %v613_v58 = vadd.f32 %v612_v56, %v551_v32 }
 0x2ff   :  { %v614_v57 = vpop.f32.mrf.mxu1 }
 0x300   :  { %v615_v59 = vadd.f32 %v614_v57, %v551_v32  ;;  %v629_v26 = vmax.f32 %v613_v58, 0.0 }
 0x301   :  { %v616_v30 = vpop.f32.mrf.mxu1 }
 0x302   :  { %v617_v60 = vadd.f32 %v616_v30, %v556_v55  ;;  %v630_v0 = vmax.f32 %v615_v59, 0.0  ;;  %v653_v5 = vmul.f32 %v641_v27, %v629_v26 }
 0x303   :  { %v618_v28 = vpop.f32.mrf.mxu1 }
 0x304   :  { %v631_v61 = vmax.f32 %v617_v60, 0.0  ;;  %v619_v62 = vadd.f32 %v618_v28, %v556_v55  ;;  %v654_v12 = vmul.f32 %v641_v27, %v630_v0 }
 0x305   :  { %v622_v63 = vpop.f32.mrf.mxu1 }
 0x306   :  { %v655_v1 = vmul.f32 %v646_v8, %v631_v61  ;;  %v632_v2 = vmax.f32 %v619_v62, 0.0  ;;  %v623_v3 = vadd.f32 %v622_v63, %v561_v29 }
 0x307   :  { %v624_v4 = vpop.f32.mrf.mxu1 }
 0x308   :  { %v656_v6 = vmul.f32 %v646_v8, %v632_v2  ;;  %v633_v7 = vmax.f32 %v623_v3, 0.0  ;;  %v625_v9 = vadd.f32 %v624_v4, %v561_v29  ;;  %v659_v13 = vadd.f32 %v655_v1, %v653_v5 }
 0x309   :  { %v626_v11 = vpop.f32.mrf.mxu1 }
 0x30a   :  { %v657_v14 = vmul.f32 %v651_v10, %v633_v7  ;;  %v634_v15 = vmax.f32 %v625_v9, 0.0  ;;  %v667_v17 = vadd.f32 %v656_v6, %v654_v12 }
 0x30b   :  { %v627_v16 = vpop.f32.mrf.mxu1 }
 0x30c   :  { %v660_v18 = vadd.f32 %v659_v13, %v657_v14  ;;  %v658_v19 = vmul.f32 %v651_v10, %v634_v15 }
 0x30e   :  { %v661_v22 = vrot.slane %v660_v18, 4  ;;  %v668_v23 = vadd.f32 %v667_v17, %v658_v19 }
 0x310   :  { %v662_v24 = vadd.f32 %v661_v22, %v660_v18  ;;  %v669_v21 = vrot.slane %v668_v23, 4 }
 0x312   :  { %v663_v39 = vrot.slane %v662_v24, 2  ;;  %v670_v41 = vadd.f32 %v669_v21, %v668_v23 }
 0x314   :  { %v664_v42 = vadd.f32 %v663_v39, %v662_v24  ;;  %v671_v40 = vrot.slane %v670_v41, 2 }
 0x316   :  { %v665_v45 = vrot.slane %v664_v42, 1  ;;  %v672_v38 = vadd.f32 %v671_v40, %v670_v41 }
 0x318   :  { %v666_v35 = vadd.f32 %v665_v45, %v664_v42  ;;  %v673_v47 = vrot.slane %v672_v38, 1 }
 0x31a   :  { %v674_v49 = vadd.f32 %v673_v47, %v672_v38  ;;  %v685_v50 = vadd.f32 %v684_v36, %v666_v35 }
 0x31c   :  { %v686_v33 = vadd.f32 %v684_v36, %v674_v49 }
 0x31e   :  { %v689_v34 = vcombine.low %v685_v50, %v686_v33 }
 0x320   :  { %v696_v52 = vrot.slane %v689_v34, %v695_v51 }
 0x322   :  { %v703_v31 = vrot.slane %v696_v52, %v695_v51 }
 0x324   :  { %709 = vst.msk [vmem:[#allocation3] sm:$0x3] %vm707_vm3, %v703_v31 }
 0x325   :  { %809 = shalt.err (!%p806_p4)
}
 0x326   :  { %719 = dma.vmem_to_hbm [thread:$0]  %s717_s25, 32, %s1149_s9, [#allocation4]  }
 0x327   :  { %818 = dma.done.wait [#allocation4], 32  }
 0x328   :  { %819 = vsyncadd [#allocation4], 4294967264 }
 0x329   :  { %723 = vsyncpa [#allocation4], 1 }

</bundles_post_ra>
